<compile_context>
chip_gen: v6e
topology: v6e:2x2x1
jax: 0.10.0
libtpu: 0.0.40
codegen_flags: <defaults>
</compile_context>

<pallas_src>
import functools

import jax
import jax.numpy as jnp
import numpy as np
from jax import lax
from jax.experimental import pallas as pl
from jax.experimental.pallas import tpu as pltpu


def _taa_kernel(spt_ref, tgt_ref, w2t_ref, b2_ref, w3_ref, b3_ref, out_ref,
                *, compute_bf16):
    # Project the item tile straight from its natural [TN, E] layout into the
    # lane-dense [H, TN] layout (q @ k^T-style contraction on the MXU, f32 acc).
    tpt = lax.dot_general(
        w2t_ref[...], tgt_ref[...],
        dimension_numbers=(((1,), (1,)), ((), ())),
        preferred_element_type=jnp.float32) + b2_ref[...]          # [H, TN] f32

    spt = spt_ref[...]                                             # [H, B]
    if compute_bf16:
        # Cast once before the batch loop: bf16 packs 2048 elems/vreg, roughly
        # doubling EUP (tanh) throughput on v6e/v7x.
        tpt = tpt.astype(jnp.bfloat16)
        spt = spt.astype(jnp.bfloat16)

    b3 = b3_ref[0]                                                 # scalar (SMEM)
    for b in range(out_ref.shape[0]):                              # B tiny: static unroll
        # Additive-attention body; tanh runs on the EUP at full lane occupancy.
        z = jnp.tanh(tpt + spt[:, b:b + 1])                        # [H, TN]
        if compute_bf16:
            # Hidden-dim reduce on the otherwise-idle MXU; f32 accumulation.
            row = jnp.dot(w3_ref[...], z,                          # [1,H]x[H,TN]
                          preferred_element_type=jnp.float32)      # [1, TN] f32
        else:
            # Exact f32 reduce (VPU mul + sublane sum); matches validated path.
            row = jnp.sum(z * w3_ref[...], axis=0, keepdims=True)  # [1, TN] f32
        out_ref[b:b + 1, :] = row + b3                             # direct row store


def _round_up(x, m):
    return ((x + m - 1) // m) * m


def _cdiv(a, b):
    return -(-a // b)


def _device_kind():
    try:
        return jax.devices()[0].device_kind.lower()
    except Exception:
        return ""


def _has_two_tensorcores(kind):
    # v7x-style chips: two TensorCores sharing a chip -> shard the item grid.
    return ("v7" in kind) or ("7x" in kind)


def _has_native_bf16_vpu(kind):
    # v6e / v7x have a bf16 VPU/EUP path; be conservative for unknown chips.
    return ("v6" in kind) or ("6e" in kind) or ("v7" in kind) or ("7x" in kind)


def _choose_tile_n(num_items, requested, two_tensorcores):
    """Lane-dense tile width (multiple of 128)."""
    if num_items <= 128:
        return 128
    n_floor = (num_items // 128) * 128           # largest 128-multiple <= N
    tn = max(128, min(_round_up(requested, 128), n_floor))
    if two_tensorcores:
        steps = _cdiv(num_items, tn)
        steps = max(2, steps + (steps % 2))      # even step count, >= 2
        tn = min(n_floor, max(128, _round_up(_cdiv(num_items, steps), 128)))
    return tn


def target_aware_attention(session_repr, target_embeddings,
                           w1, b1, w2, b2, w3, b3, *,
                           tile_n=8192, compute_in_bf16=None):
    """session_repr: [B, E]; target_embeddings: [N, E] (f32 or bf16) -> [B, N] f32.

    Linear weights are stored pre-transposed vs nn.Linear: w1/w2: [E, H],
    b1/b2: [H], w3: [H], b3: [1].

    The catalog is streamed exactly as supplied (no transpose / cast / pad
    passes over it); callers with a static catalog should cache it in bf16 to
    halve the dominant HBM stream.  Accumulation is f32 either way.
    """
    B, E = session_repr.shape
    N, _ = target_embeddings.shape
    H = w1.shape[1]

    kind = _device_kind()
    if compute_in_bf16 is None:
        compute_in_bf16 = _has_native_bf16_vpu(kind)
    two_tc = _has_two_tensorcores(kind)

    # Grid-invariant session projection, hoisted out of the per-tile body
    # (tiny [B,E]x[E,H]); transposed so hidden sits on sublanes, batch on lanes.
    spt = (session_repr.astype(jnp.float32) @ w1 + b1).T.astype(jnp.float32)   # [H, B]

    # Tiny grid-invariant operands. W2^T matches the catalog dtype so the MXU
    # sees homogeneous inputs.
    tgt_dtype = target_embeddings.dtype
    w2t = w2.T.astype(tgt_dtype)                                   # [H, E]
    b2_col = b2.reshape(H, 1).astype(jnp.float32)                  # [H, 1]
    b3_vec = jnp.asarray(b3).reshape(1).astype(jnp.float32)        # scalar in SMEM
    if compute_in_bf16:
        w3_op = w3.reshape(1, H).astype(jnp.bfloat16)              # MXU reduce layout
        w3_spec = pl.BlockSpec((1, H), lambda j: (0, 0))
    else:
        w3_op = w3.reshape(H, 1).astype(jnp.float32)               # VPU reduce layout
        w3_spec = pl.BlockSpec((H, 1), lambda j: (0, 0))

    tn = _choose_tile_n(N, tile_n, two_tc)
    grid = (_cdiv(N, tn),)

    # VMEM budget: double-buffered catalog + output tiles, elementwise temps,
    # constants; generous headroom but far below v7x's 64 MiB per-TC VMEM.
    tb = jnp.dtype(tgt_dtype).itemsize
    cb = 2 if compute_in_bf16 else 4
    est = (2 * tn * E * tb + 2 * B * tn * 4
           + tn * H * (4 + 2 * cb) + (1 << 20))
    vmem_limit = int(min(max(2 * est, 16 << 20), 40 << 20))

    kernel = functools.partial(_taa_kernel, compute_bf16=bool(compute_in_bf16))

    return pl.pallas_call(
        kernel,
        out_shape=jax.ShapeDtypeStruct((B, N), jnp.float32),
        grid_spec=pltpu.PrefetchScalarGridSpec(
            num_scalar_prefetch=0,
            grid=grid,
            in_specs=[
                pl.BlockSpec((H, B), lambda j: (0, 0)),            # sp.T (hoisted)
                pl.BlockSpec((tn, E), lambda j: (j, 0)),           # catalog tile (natural layout)
                pl.BlockSpec((H, E), lambda j: (0, 0)),            # W2.T
                pl.BlockSpec((H, 1), lambda j: (0, 0)),            # b2
                w3_spec,                                           # w3 (layout per reduce path)
                pl.BlockSpec(memory_space=pltpu.MemorySpace.SMEM), # b3 scalar
            ],
            out_specs=pl.BlockSpec((B, tn), lambda j: (0, j)),
        ),
        compiler_params=pltpu.CompilerParams(
            dimension_semantics=("parallel",),
            vmem_limit_bytes=vmem_limit),
    )(spt, target_embeddings, w2t, b2_col, w3_op, b3_vec)


def _init_linear(key, fan_in, fan_out):
    """Deterministic init mimicking nn.Linear (uniform +-1/sqrt(fan_in))."""
    kw, kb = jax.random.split(key)
    bound = 1.0 / np.sqrt(fan_in)
    w = jax.random.uniform(kw, (fan_in, fan_out), jnp.float32, -bound, bound)
    b = jax.random.uniform(kb, (fan_out,), jnp.float32, -bound, bound)
    return w, b


if __name__ == "__main__":
    EMBEDDING_DIM = 32
    HIDDEN_DIM = 32
    BATCH = 2
    NUM_ITEMS = 300   # deliberately not a multiple of 128: exercises ragged-tail masking

    key = jax.random.PRNGKey(0)
    k_sess, k_tgt, k1, k2, k3 = jax.random.split(key, 5)

    session_repr = jax.random.normal(k_sess, (BATCH, EMBEDDING_DIM), jnp.float32)
    target_embeddings = jax.random.normal(k_tgt, (NUM_ITEMS, EMBEDDING_DIM),
                                          jnp.float32)

    w1, b1 = _init_linear(k1, EMBEDDING_DIM, HIDDEN_DIM)   # W_1
    w2, b2 = _init_linear(k2, EMBEDDING_DIM, HIDDEN_DIM)   # W_2
    w3, b3 = _init_linear(k3, HIDDEN_DIM, 1)               # W_3
    w3 = w3[:, 0]                                          # [H]

    # Pure-JAX reference for correctness checks.
    sp_ref = session_repr @ w1 + b1
    tp_ref = target_embeddings @ w2 + b2
    h_ref = jnp.tanh(sp_ref[:, None, :] + tp_ref[None, :, :])
    ref = jnp.einsum("bnh,h->bn", h_ref, w3) + b3[0]

    # 1) Exact-precision path (f32 everywhere) -- tight tolerance.
    scores = target_aware_attention(session_repr, target_embeddings,
                                    w1, b1, w2, b2, w3, b3,
                                    compute_in_bf16=False)
    scores = jax.block_until_ready(scores)
    assert scores.shape == (BATCH, NUM_ITEMS)
    np.testing.assert_allclose(np.asarray(scores), np.asarray(ref),
                               rtol=1e-5, atol=1e-5)

    # 2) Fast path: caller-cached bf16 catalog + auto compute dtype
    #    (bf16 tanh / MXU reduce on v6e/v7x, f32 on v5e) -- loose tolerance.
    scores_fast = target_aware_attention(session_repr,
                                         target_embeddings.astype(jnp.bfloat16),
                                         w1, b1, w2, b2, w3, b3)
    scores_fast = jax.block_until_ready(scores_fast)
    assert scores_fast.shape == (BATCH, NUM_ITEMS)
    np.testing.assert_allclose(np.asarray(scores_fast), np.asarray(ref),
                               rtol=5e-2, atol=5e-2)

    print("KERNEL_OK")
</pallas_src>

<mosaic_0001>
module attributes {stable_mosaic.version = 11 : i64} {
  func.func @_taa_kernel(%arg0: i32, %arg1: memref<32x2xf32, #tpu.memory_space<vmem>>, %arg2: memref<256x32xf32, #tpu.memory_space<vmem>>, %arg3: memref<32x32xf32, #tpu.memory_space<vmem>>, %arg4: memref<32x1xf32, #tpu.memory_space<vmem>>, %arg5: memref<32x1xf32, #tpu.memory_space<vmem>>, %arg6: memref<1xf32, #tpu.memory_space<smem>>, %arg7: memref<2x256xf32, #tpu.memory_space<vmem>>) attributes {dimension_semantics = [#tpu.dimension_semantics<parallel>], iteration_bounds = array<i64: 2>, scalar_prefetch = 0 : i64, scratch_operands = 0 : i64, tpu.core_type = #tpu.core_type<tc>, window_params = [{pipeline_mode = #tpu.pipeline_mode<synchronous>, transform_indices = @transform_0, window_bounds = array<i64: 32, 2>}, {transform_indices = @transform_1, window_bounds = array<i64: 256, 32>}, {pipeline_mode = #tpu.pipeline_mode<synchronous>, transform_indices = @transform_2, window_bounds = array<i64: 32, 32>}, {pipeline_mode = #tpu.pipeline_mode<synchronous>, transform_indices = @transform_3, window_bounds = array<i64: 32, 1>}, {pipeline_mode = #tpu.pipeline_mode<synchronous>, transform_indices = @transform_4, window_bounds = array<i64: 32, 1>}, {transform_indices = @transform_5, window_bounds = array<i64: 1>}, {transform_indices = @transform_6, window_bounds = array<i64: 2, 256>}]} {
    %c0 = arith.constant 0 : index
    %c0_0 = arith.constant 0 : index
    %0 = vector.load %arg3[%c0, %c0_0] : memref<32x32xf32, #tpu.memory_space<vmem>>, vector<32x32xf32>
    %c0_1 = arith.constant 0 : index
    %c0_2 = arith.constant 0 : index
    %1 = vector.load %arg2[%c0_1, %c0_2] : memref<256x32xf32, #tpu.memory_space<vmem>>, vector<256x32xf32>
    %cst = arith.constant dense<0.000000e+00> : vector<32x256xf32>
    %2 = tpu.matmul %0, %1, %cst {dimension_numbers = #tpu.dot_dimension_numbers<[1], [1], [0], [0], [0, 0, 1, 0], [], []>} : vector<32x32xf32>, vector<256x32xf32>, vector<32x256xf32> -> vector<32x256xf32>
    %c0_3 = arith.constant 0 : index
    %c0_4 = arith.constant 0 : index
    %3 = vector.load %arg4[%c0_3, %c0_4] : memref<32x1xf32, #tpu.memory_space<vmem>>, vector<32x1xf32>
    %4 = vector.broadcast %3 : vector<32x1xf32> to vector<32x256xf32>
    %5 = arith.addf %2, %4 : vector<32x256xf32>
    %c0_5 = arith.constant 0 : index
    %c0_6 = arith.constant 0 : index
    %6 = vector.load %arg1[%c0_5, %c0_6] : memref<32x2xf32, #tpu.memory_space<vmem>>, vector<32x2xf32>
    %c0_7 = arith.constant 0 : index
    %7 = memref.load %arg6[%c0_7] : memref<1xf32, #tpu.memory_space<smem>>
    %8 = vector.extract_strided_slice %6 {offsets = [0, 0], sizes = [32, 1], strides = [1, 1]} : vector<32x2xf32> to vector<32x1xf32>
    %9 = vector.broadcast %8 : vector<32x1xf32> to vector<32x256xf32>
    %10 = arith.addf %5, %9 : vector<32x256xf32>
    %11 = math.tanh %10 : vector<32x256xf32>
    %c0_8 = arith.constant 0 : index
    %c0_9 = arith.constant 0 : index
    %12 = vector.load %arg5[%c0_8, %c0_9] : memref<32x1xf32, #tpu.memory_space<vmem>>, vector<32x1xf32>
    %13 = vector.broadcast %12 : vector<32x1xf32> to vector<32x256xf32>
    %14 = arith.mulf %11, %13 : vector<32x256xf32>
    %cst_10 = arith.constant dense<0.000000e+00> : vector<256xf32>
    %15 = vector.multi_reduction <add>, %14, %cst_10 [0] : vector<32x256xf32> to vector<256xf32>
    %16 = vector.shape_cast %15 : vector<256xf32> to vector<1x256xf32>
    %17 = vector.broadcast %7 : f32 to vector<1x256xf32>
    %18 = arith.addf %16, %17 : vector<1x256xf32>
    %c0_11 = arith.constant 0 : index
    %c0_12 = arith.constant 0 : index
    %19 = vector.load %arg7[%c0_11, %c0_12] : memref<2x256xf32, #tpu.memory_space<vmem>>, vector<1x256xf32>
    tpu.vector_store %arg7[%c0_11, %c0_12], %18 {strides = array<i32>} : memref<2x256xf32, #tpu.memory_space<vmem>>, vector<1x256xf32>,
    %20 = vector.extract_strided_slice %6 {offsets = [0, 1], sizes = [32, 1], strides = [1, 1]} : vector<32x2xf32> to vector<32x1xf32>
    %21 = vector.broadcast %20 : vector<32x1xf32> to vector<32x256xf32>
    %22 = arith.addf %5, %21 : vector<32x256xf32>
    %23 = math.tanh %22 : vector<32x256xf32>
    %c0_13 = arith.constant 0 : index
    %c0_14 = arith.constant 0 : index
    %24 = vector.load %arg5[%c0_13, %c0_14] : memref<32x1xf32, #tpu.memory_space<vmem>>, vector<32x1xf32>
    %25 = vector.broadcast %24 : vector<32x1xf32> to vector<32x256xf32>
    %26 = arith.mulf %23, %25 : vector<32x256xf32>
    %cst_15 = arith.constant dense<0.000000e+00> : vector<256xf32>
    %27 = vector.multi_reduction <add>, %26, %cst_15 [0] : vector<32x256xf32> to vector<256xf32>
    %28 = vector.shape_cast %27 : vector<256xf32> to vector<1x256xf32>
    %29 = vector.broadcast %7 : f32 to vector<1x256xf32>
    %30 = arith.addf %28, %29 : vector<1x256xf32>
    %c1 = arith.constant 1 : index
    %c0_16 = arith.constant 0 : index
    %31 = vector.load %arg7[%c1, %c0_16] : memref<2x256xf32, #tpu.memory_space<vmem>>, vector<1x256xf32>
    tpu.vector_store %arg7[%c1, %c0_16], %30 {strides = array<i32>} : memref<2x256xf32, #tpu.memory_space<vmem>>, vector<1x256xf32>,
    return
  }
  func.func @transform_0(%arg0: i32) -> (i32, i32) {
    %c0_i32 = arith.constant 0 : i32
    %c0_i32_0 = arith.constant 0 : i32
    %c0_i32_1 = arith.constant 0 : i32
    return %c0_i32, %c0_i32_0 : i32, i32
  }
  func.func @transform_1(%arg0: i32) -> (i32, i32) {
    %c0_i32 = arith.constant 0 : i32
    %c0_i32_0 = arith.constant 0 : i32
    return %arg0, %c0_i32 : i32, i32
  }
  func.func @transform_2(%arg0: i32) -> (i32, i32) {
    %c0_i32 = arith.constant 0 : i32
    %c0_i32_0 = arith.constant 0 : i32
    %c0_i32_1 = arith.constant 0 : i32
    return %c0_i32, %c0_i32_0 : i32, i32
  }
  func.func @transform_3(%arg0: i32) -> (i32, i32) {
    %c0_i32 = arith.constant 0 : i32
    %c0_i32_0 = arith.constant 0 : i32
    %c0_i32_1 = arith.constant 0 : i32
    return %c0_i32, %c0_i32_0 : i32, i32
  }
  func.func @transform_4(%arg0: i32) -> (i32, i32) {
    %c0_i32 = arith.constant 0 : i32
    %c0_i32_0 = arith.constant 0 : i32
    %c0_i32_1 = arith.constant 0 : i32
    return %c0_i32, %c0_i32_0 : i32, i32
  }
  func.func @transform_5(%arg0: i32) -> i32 {
    %c0_i32 = arith.constant 0 : i32
    %c0_i32_0 = arith.constant 0 : i32
    return %c0_i32 : i32
  }
  func.func @transform_6(%arg0: i32) -> (i32, i32) {
    %c0_i32 = arith.constant 0 : i32
    %c0_i32_0 = arith.constant 0 : i32
    return %c0_i32, %arg0 : i32, i32
  }
}

</mosaic_0001>

<bundles_post_ra>
// kernel: tpu_custom_call.1
= control target key start
LH: loop header
LB: loop body
LE: loop exit
PB: predicated region body
PF: predicated region fallthrough
CT: control target
= control target key end

     0   :  { %s1416_s0 = inlined_call_operand.vmem [shape: f32[32,2], index: 0, kind: input, shape index: {}]   ;;  %s1417_s1 = inlined_call_operand.vmem [shape: f32[300,32], index: 1, kind: input, shape index: {}]   ;;  %s1418_s2 = inlined_call_operand.vmem [shape: f32[32,32], index: 2, kind: input, shape index: {}]   ;;  %s1419_s3 = inlined_call_operand.vmem [shape: f32[32,1], index: 3, kind: input, shape index: {}]   ;;  %s1420_s4 = inlined_call_operand.vmem [shape: f32[32,1], index: 4, kind: input, shape index: {}]   ;;  %s1421_s5 = inlined_call_operand.<no memory space> [shape: f32[1], index: 5, kind: input, shape index: {}]   ;;  %s1422_s6 = inlined_call_operand.hbm [shape: f32[2,300], index: 6, kind: output, shape index: {}]  }
   0x1   :  { %11 = sst [smem:[#allocation2]] %s1421_s5 }
   0x2   :  { %12 = vsyncpa [#allocation4], 0 }
   0x3   :  { %14 = vsyncpa [#allocation4 + $0x1], 0  ;;  %s1146_s23 = smov 0   ;;  %s1148_s24 = smov 0  }
   0x4   :  { %s1150_s25 = smov 0   ;;  %s1152_s26 = smov 0  }
   0x5 LB: > { %s1167_s5 = sadd.s32 4294967295, %s1102_s26   ;;  %s837_s27 = sadd.s32 4294967294, %s1102_s26   ;;  %s1102_s26 = sphi %s1152_s26, %s1428_s26   ;;  %s1098_s25 = sphi %s1150_s25, %s1427_s25   ;;  %s1094_s24 = sphi %s1148_s24, %s1426_s24   ;;  %s1090_s23 = sphi %s1146_s23, %s1425_s23  }
   0x6   : > { %s1171_s28 = sadd.s32 1, %s1102_s26   ;;  %s158_s29 = sadd.s32 1, %s1098_s25 }
   0x7   : > { %s155_s30 = ssub.s32 %s1102_s26, %s1171_s28  ;;  %p168_p0 = scmp.ne.s32.totalorder %s1098_s25, %s1094_s24 }
   0x8   : > { %p156_p1 = scmp.eq.s32.totalorder %s155_s30, 0  ;;  %p169_p2 = scmp.eq.s32.totalorder %s1167_s5, 1 }
   0x9   : > { %p174_p3 = scmp.ne.s32.totalorder %s1094_s24, %s1090_s23  ;;  %p175_p4 = scmp.eq.s32.totalorder %s837_s27, 1 }
   0xa   : > { %s1182_s7 = scalar_select %p156_p1, %s1098_s25, %s158_s29  }
   0xb   : > { %p1184_p5 = por %p169_p2, %p168_p0  ;;  %p1188_p6 = por %p175_p4, %p174_p3 }
   0xc   : > { %p840_p7 = scmp.ge.s32.totalorder %s1102_s26, 1  ;;  %p225_p8 = scmp.lt.s32.totalorder %s1102_s26, 3 }
   0xe   : > { %p226_p9 = pnand %p840_p7, %p225_p8 }
   0xf   : > { %s842_s10 = sshll.u32 (!%p226_p9), %s1167_s5, 5  ;;  %s540_s16 = sld [smem:[#allocation2]] (!%p226_p9) }
  0x10   : > { %229 = sbr.rel (%p226_p9) target bundleno = 368 (0x170), region = 44  ;;  %p264_p10 = scmp.lt.s32.totalorder (!%p226_p9), %s842_s10, 37 }
  0x15   : > { %vm338_vm0 = vcmask 261120   ;;  %v1198_v0 = vld [vmem:[%s1418_s2] sm:$0xff]  ;;  %v1203_v1 = vld [vmem:[%s1418_s2 + $0x10] sm:$0xff]  ;;  %v1104_v3 = vmov 0   ;;  %s1430_s10 = smov (!%p264_p10, %s842_s10), 37  ;;  %v315_v9 = vld [vmem:[%s1419_s3 + $0x8] sm:$0xff] }
  0x16   : > { %923 = vmatprep.mubr.msk.f32.mxu0 %vm338_vm0, %v1198_v0  ;;  %927 = vmatprep.mubr.msk.f32.mxu1 %vm338_vm0, %v1203_v1  ;;  %v316_v2 = vld [vmem:[%s1419_s3 + $0x10] sm:$0xff]  ;;  %v314_v4 = vld [vmem:[%s1419_s3] sm:$0xff]  ;;  %s843_s21 = sshll.u32 %s1430_s10, 3  ;;  %v1105_v12 = vmov 1   ;;  %v537_v13 = vld [vmem:[%s1416_s0 + $0x8] sm:$0xff]  ;;  %s882_s20 = sshll.u32 (%p1184_p5), %s1167_s5, 1 }
  0x17   : > { %1005 = vset.pattern.permute.xlu1 %v1104_v3  ;;  %1004 = vset.pattern.permute.xlu0 %v1104_v3  ;;  %v536_v5 = vld [vmem:[%s1416_s0] sm:$0xff]  ;;  %s1223_s29 = scalar_lea.vmem %s1417_s1, %s843_s21  ;;  %v317_v16 = vld [vmem:[%s1419_s3 + $0x18] sm:$0xff]  ;;  %v538_v19 = vld [vmem:[%s1416_s0 + $0x10] sm:$0xff]  ;;  %s766_s21 = ssub.s32 (%p1184_p5), 3, %s882_s20 }
  0x18   : > { %330 = vperm.xlu1 %1005, %v316_v2   ;;  %320 = vperm.xlu0 %1004, %v314_v4   ;;  %v313_v6 = vld [vmem:[%s1223_s29 + $0xf8] sm:$0xff]  ;;  %v312_v8 = vld [vmem:[%s1223_s29 + $0xf0] sm:$0xff]  ;;  %v311_v11 = vld [vmem:[%s1223_s29 + $0xe8] sm:$0xff]  ;;  %p767_p11 = scmp.lt.s32.totalorder (%p1184_p5), %s766_s21, 2 }
  0x19   : > { %v297_v7 = vld [vmem:[%s1223_s29 + $0x78] sm:$0xff]  ;;  %891 = vmatprep.subr.msk.mxu0 %vm338_vm0, %v313_v6  ;;  %931 = vmatprep.subr.msk.mxu1 %vm338_vm0, %v313_v6  ;;  %v296_v10 = vld [vmem:[%s1223_s29 + $0x70] sm:$0xff]  ;;  %v295_v14 = vld [vmem:[%s1223_s29 + $0x68] sm:$0xff] }
  0x1a   : > { %892 = vmatpush3.xpose.msk.msra.mxu0 %vm338_vm0, %v297_v7  ;;  %947 = vmatpush3.xpose.msk.msra.mxu1 %vm338_vm0, %v297_v7  ;;  %v310_v15 = vld [vmem:[%s1223_s29 + $0xe0] sm:$0xff]  ;;  %v309_v18 = vld [vmem:[%s1223_s29 + $0xd8] sm:$0xff]  ;;  %v308_v21 = vld [vmem:[%s1223_s29 + $0xd0] sm:$0xff] }
  0x1b   : > { %893 = vmatprep.subr.msk.mxu0 %vm338_vm0, %v312_v8  ;;  %932 = vmatprep.subr.msk.mxu1 %vm338_vm0, %v312_v8  ;;  %v294_v17 = vld [vmem:[%s1223_s29 + $0x60] sm:$0xff]  ;;  %v293_v20 = vld [vmem:[%s1223_s29 + $0x58] sm:$0xff]  ;;  %v292_v23 = vld [vmem:[%s1223_s29 + $0x50] sm:$0xff] }
  0x1c   : > { %543 = vperm.xlu1 %1005, %v536_v5   ;;  %325 = vperm.xlu0 %1004, %v315_v9   ;;  %v539_v22 = vld [vmem:[%s1416_s0 + $0x18] sm:$0xff]  ;;  %v307_v24 = vld [vmem:[%s1223_s29 + $0xc8] sm:$0xff]  ;;  %v577_v25 = vld [vmem:[%s1420_s4] sm:$0xff] }
  0x1d   : > { %v291_v26 = vld [vmem:[%s1223_s29 + $0x48] sm:$0xff]  ;;  %v306_v27 = vld [vmem:[%s1223_s29 + $0xc0] sm:$0xff]  ;;  %v305_v30 = vld [vmem:[%s1223_s29 + $0xb8] sm:$0xff] }
  0x1e   : > { %894 = vmatpush3.xpose.msk.msra.mxu0 %vm338_vm0, %v296_v10  ;;  %948 = vmatpush3.xpose.msk.msra.mxu1 %vm338_vm0, %v296_v10  ;;  %v290_v28 = vld [vmem:[%s1223_s29 + $0x40] sm:$0xff]  ;;  %v686_v29 = vld [vmem:[%s1420_s4 + $0x8] sm:$0xff]  ;;  %v289_v31 = vld [vmem:[%s1223_s29 + $0x38] sm:$0xff] }
  0x1f   : > { %895 = vmatprep.subr.msk.mxu0 %vm338_vm0, %v311_v11  ;;  %933 = vmatprep.subr.msk.mxu1 %vm338_vm0, %v311_v11  ;;  %v687_v32 = vld [vmem:[%s1420_s4 + $0x10] sm:$0xff]  ;;  %v688_v35 = vld [vmem:[%s1420_s4 + $0x18] sm:$0xff]  ;;  %v303_v36 = vld [vmem:[%s1223_s29 + $0xa8] sm:$0xff] }
  0x20   : > { %1006 = vset.pattern.permute.xlu1 %v1105_v12  ;;  %548 = vperm.xlu0 %1004, %v537_v13   ;;  %v304_v33 = vld [vmem:[%s1223_s29 + $0xb0] sm:$0xff]  ;;  %v287_v37 = vld [vmem:[%s1223_s29 + $0x28] sm:$0xff]  ;;  %v302_v38 = vld [vmem:[%s1223_s29 + $0xa0] sm:$0xff] }
  0x21   : > { %654 = vperm.xlu1 %1006, %v536_v5   ;;  %v288_v34 = vld [vmem:[%s1223_s29 + $0x30] sm:$0xff]  ;;  %v286_v39 = vld [vmem:[%s1223_s29 + $0x20] sm:$0xff]  ;;  %v301_v40 = vld [vmem:[%s1223_s29 + $0x98] sm:$0xff] }
  0x22   : > { %896 = vmatpush3.xpose.msk.msra.mxu0 %vm338_vm0, %v295_v14  ;;  %949 = vmatpush3.xpose.msk.msra.mxu1 %vm338_vm0, %v295_v14  ;;  %v285_v41 = vld [vmem:[%s1223_s29 + $0x18] sm:$0xff]  ;;  %v300_v42 = vld [vmem:[%s1223_s29 + $0x90] sm:$0xff]  ;;  %v299_v44 = vld [vmem:[%s1223_s29 + $0x88] sm:$0xff] }
  0x23   : > { %897 = vmatprep.subr.msk.mxu0 %vm338_vm0, %v310_v15  ;;  %934 = vmatprep.subr.msk.mxu1 %vm338_vm0, %v310_v15  ;;  %v284_v43 = vld [vmem:[%s1223_s29 + $0x10] sm:$0xff]  ;;  %v283_v45 = vld [vmem:[%s1223_s29 + $0x8] sm:$0xff]  ;;  %v298_v46 = vld [vmem:[%s1223_s29 + $0x80] sm:$0xff] }
  0x24   : > { %1007 = vset.pattern.permute.xlu0 %v1105_v12  ;;  %v282_v47 = vld [vmem:[%s1223_s29] sm:$0xff]  ;;  %v279_v48 = vld [vmem:[%s1418_s2 + $0x8] sm:$0xff]  ;;  %v281_v49 = vld [vmem:[%s1418_s2 + $0x18] sm:$0xff]  ;;  %s256_s29 = sand.u32 1, %s1094_s24  }
  0x25   : > { %1008 = vset.pattern.permute.xlu1 %v1104_v3  ;;  %658 = vperm.xlu0 %1007, %v537_v13   ;;  %s841_s17 = sshll.u32 %s256_s29, 2  ;;  %s1369_s19 = scalar_lea.sflag [#allocation4], %s256_s29 }
  0x26   : > { %335 = vperm.xlu1 %1008, %v317_v16   ;;  %898 = vmatpush3.xpose.msk.msra.mxu0 %vm338_vm0, %v294_v17  ;;  %s258_s18 = scalar_lea.vmem [#allocation3], %s841_s17 }
  0x27   : > { %950 = vmatpush3.xpose.msk.msra.mxu1 %vm338_vm0, %v294_v17  ;;  %899 = vmatprep.subr.msk.mxu0 %vm338_vm0, %v309_v18 }
  0x28   : > { %935 = vmatprep.subr.msk.mxu1 %vm338_vm0, %v309_v18 }
  0x29   : > { %662 = vperm.xlu0 %1007, %v538_v19  }
  0x2a   : > { %553 = vperm.xlu1 %1008, %v538_v19   ;;  %900 = vmatpush3.xpose.msk.msra.mxu0 %vm338_vm0, %v293_v20 }
  0x2b   : > { %951 = vmatpush3.xpose.msk.msra.mxu1 %vm338_vm0, %v293_v20  ;;  %901 = vmatprep.subr.msk.mxu0 %vm338_vm0, %v308_v21 }
  0x2c   : > { %936 = vmatprep.subr.msk.mxu1 %vm338_vm0, %v308_v21 }
  0x2d   : > { %666 = vperm.xlu0 %1007, %v539_v22  }
  0x2e   : > { %558 = vperm.xlu1 %1008, %v539_v22   ;;  %902 = vmatpush3.xpose.msk.msra.mxu0 %vm338_vm0, %v292_v23 }
  0x2f   : > { %952 = vmatpush3.xpose.msk.msra.mxu1 %vm338_vm0, %v292_v23  ;;  %903 = vmatprep.subr.msk.mxu0 %vm338_vm0, %v307_v24 }
  0x30   : > { %937 = vmatprep.subr.msk.mxu1 %vm338_vm0, %v307_v24 }
  0x31   : > { %1009 = vset.pattern.permute.xlu0 %v1104_v3 }
  0x32   : > { %583 = vperm.xlu1 %1008, %v577_v25   ;;  %904 = vmatpush3.xpose.msk.msra.mxu0 %vm338_vm0, %v291_v26 }
  0x33   : > { %953 = vmatpush3.xpose.msk.msra.mxu1 %vm338_vm0, %v291_v26  ;;  %905 = vmatprep.subr.msk.mxu0 %vm338_vm0, %v306_v27 }
  0x34   : > { %938 = vmatprep.subr.msk.mxu1 %vm338_vm0, %v306_v27  ;;  %588 = vperm.xlu0 %1009, %v686_v29  }
  0x36   : > { %691 = vperm.xlu1 %1008, %v577_v25   ;;  %906 = vmatpush3.xpose.msk.msra.mxu0 %vm338_vm0, %v290_v28 }
  0x37   : > { %954 = vmatpush3.xpose.msk.msra.mxu1 %vm338_vm0, %v290_v28  ;;  %907 = vmatprep.subr.msk.mxu0 %vm338_vm0, %v305_v30 }
  0x38   : > { %939 = vmatprep.subr.msk.mxu1 %vm338_vm0, %v305_v30  ;;  %593 = vperm.xlu0 %1009, %v687_v32  }
  0x3a   : > { %696 = vperm.xlu1 %1008, %v686_v29   ;;  %908 = vmatpush3.xpose.msk.msra.mxu0 %vm338_vm0, %v289_v31 }
  0x3b   : > { %955 = vmatpush3.xpose.msk.msra.mxu1 %vm338_vm0, %v289_v31  ;;  %909 = vmatprep.subr.msk.mxu0 %vm338_vm0, %v304_v33 }
  0x3c   : > { %940 = vmatprep.subr.msk.mxu1 %vm338_vm0, %v304_v33  ;;  %598 = vperm.xlu0 %1009, %v688_v35  }
  0x3e   : > { %701 = vperm.xlu1 %1008, %v687_v32   ;;  %910 = vmatpush3.xpose.msk.msra.mxu0 %vm338_vm0, %v288_v34 }
  0x3f   : > { %956 = vmatpush3.xpose.msk.msra.mxu1 %vm338_vm0, %v288_v34  ;;  %911 = vmatprep.subr.msk.mxu0 %vm338_vm0, %v303_v36 }
  0x40   : > { %941 = vmatprep.subr.msk.mxu1 %vm338_vm0, %v303_v36 }
  0x42   : > { %706 = vperm.xlu1 %1008, %v688_v35   ;;  %912 = vmatpush3.xpose.msk.msra.mxu0 %vm338_vm0, %v287_v37 }
  0x43   : > { %957 = vmatpush3.xpose.msk.msra.mxu1 %vm338_vm0, %v287_v37  ;;  %913 = vmatprep.subr.msk.mxu0 %vm338_vm0, %v302_v38 }
  0x44   : > { %942 = vmatprep.subr.msk.mxu1 %vm338_vm0, %v302_v38 }
  0x46   : > { %914 = vmatpush3.xpose.msk.msra.mxu0 %vm338_vm0, %v286_v39 }
  0x47   : > { %958 = vmatpush3.xpose.msk.msra.mxu1 %vm338_vm0, %v286_v39  ;;  %915 = vmatprep.subr.msk.mxu0 %vm338_vm0, %v301_v40 }
  0x48   : > { %943 = vmatprep.subr.msk.mxu1 %vm338_vm0, %v301_v40 }
  0x4a   : > { %916 = vmatpush3.xpose.msk.msra.mxu0 %vm338_vm0, %v285_v41 }
  0x4b   : > { %959 = vmatpush3.xpose.msk.msra.mxu1 %vm338_vm0, %v285_v41  ;;  %917 = vmatprep.subr.msk.mxu0 %vm338_vm0, %v300_v42 }
  0x4c   : > { %944 = vmatprep.subr.msk.mxu1 %vm338_vm0, %v300_v42 }
  0x4e   : > { %918 = vmatpush3.xpose.msk.msra.mxu0 %vm338_vm0, %v284_v43 }
  0x4f   : > { %960 = vmatpush3.xpose.msk.msra.mxu1 %vm338_vm0, %v284_v43  ;;  %919 = vmatprep.subr.msk.mxu0 %vm338_vm0, %v299_v44 }
  0x50   : > { %945 = vmatprep.subr.msk.mxu1 %vm338_vm0, %v299_v44 }
  0x52   : > { %920 = vmatpush3.xpose.msk.msra.mxu0 %vm338_vm0, %v283_v45 }
  0x53   : > { %961 = vmatpush3.xpose.msk.msra.mxu1 %vm338_vm0, %v283_v45  ;;  %921 = vmatprep.subr.msk.mxu0 %vm338_vm0, %v298_v46 }
  0x54   : > { %946 = vmatprep.subr.msk.mxu1 %vm338_vm0, %v298_v46 }
  0x56   : > { %922 = vmatpush3.xpose.msk.msra.mxu0 %vm338_vm0, %v282_v47 }
  0x57   : > { %962 = vmatpush3.xpose.msk.msra.mxu1 %vm338_vm0, %v282_v47 }
  0x59   : > { %924 = vmatmul.mubr.msk.f32.vlgmr.msra.gmra.mxu0 %vm338_vm0, %v1198_v0 }
  0x5a   : > { %928 = vmatmul.mubr.msk.f32.vlgmr.msra.gmra.mxu1 %vm338_vm0, %v1203_v1  ;;  %925 = vmatprep.mubr.msk.f32.mxu0 %vm338_vm0, %v279_v48 }
  0x5b   : > { %929 = vmatprep.mubr.msk.f32.mxu1 %vm338_vm0, %v281_v49 }
  0x5d   : > { %926 = vmatmul.mubr.msk.f32.gmra.mxu0 %vm338_vm0, %v279_v48 }
  0x5e   : > { %930 = vmatmul.mubr.msk.f32.gmra.mxu1 %vm338_vm0, %v281_v49 }
  0x93   : > { %v331_v50 = vpop.permute.xlu1 %330  ;;  %v321_v52 = vpop.permute.xlu0 %320 }
  0x97   : > { %v544_v51 = vpop.permute.xlu1 %543  ;;  %v326_v54 = vpop.permute.xlu0 %325 }
  0x9b   : > { %v549_v56 = vpop.permute.xlu0 %548 }
  0x9c   : > { %v655_v53 = vpop.permute.xlu1 %654 }
  0xa0   : > { %v659_v58 = vpop.permute.xlu0 %658 }
  0xa1   : > { %v336_v55 = vpop.permute.xlu1 %335 }
  0xa4   : > { %v663_v2 = vpop.permute.xlu0 %662 }
  0xa5   : > { %v554_v57 = vpop.permute.xlu1 %553 }
  0xa8   : > { %v667_v23 = vpop.permute.xlu0 %666 }
  0xa9   : > { %v559_v61 = vpop.permute.xlu1 %558 }
  0xad   : > { %v584_v15 = vpop.permute.xlu1 %583 }
  0xaf   : > { %v589_v33 = vpop.permute.xlu0 %588 }
  0xb1   : > { %v692_v27 = vpop.permute.xlu1 %691 }
  0xb3   : > { %v594_v41 = vpop.permute.xlu0 %593 }
  0xb5   : > { %v697_v35 = vpop.permute.xlu1 %696 }
  0xb9   : > { %v702_v43 = vpop.permute.xlu1 %701 }
 0x119   : > { %v513_v59 = vpop.f32.mrf.mxu0 }
 0x11a   : > { %v525_v60 = vpop.f32.mrf.mxu1  ;;  %v514_v62 = vadd.f32 %v513_v59, %v321_v52  ;;  %v707_v59 = vpop.permute.xlu1 %706 }
 0x11b   : > { %v526_v63 = vadd.f32 %v525_v60, %v331_v50  ;;  %v515_v0 = vpop.f32.mrf.mxu0 }
 0x11c   : > { %v527_v1 = vpop.f32.mrf.mxu1  ;;  %v561_v3 = vadd.f32 %v544_v51, %v514_v62  ;;  %v669_v4 = vadd.f32 %v655_v53, %v514_v62  ;;  %v516_v7 = vadd.f32 %v515_v0, %v321_v52 }
 0x11d   : > { %v565_v5 = vadd.f32 %v554_v57, %v526_v63  ;;  %v673_v6 = vadd.f32 %v663_v2, %v526_v63  ;;  %v528_v8 = vadd.f32 %v527_v1, %v331_v50  ;;  %v519_v9 = vpop.f32.mrf.mxu0 }
 0x11e   : > { %v531_v10 = vpop.f32.mrf.mxu1  ;;  %1010 = vtanh.f32 %v561_v3  ;;  %v520_v11 = vadd.f32 %v519_v9, %v326_v54  ;;  %v562_v12 = vadd.f32 %v544_v51, %v516_v7  ;;  %v670_v13 = vadd.f32 %v655_v53, %v516_v7 }
 0x11f   : > { %1012 = vtanh.f32 %v669_v4  ;;  %v521_v14 = vpop.f32.mrf.mxu0  ;;  %v566_v16 = vadd.f32 %v554_v57, %v528_v8  ;;  %v532_v17 = vadd.f32 %v531_v10, %v336_v55  ;;  %v674_v18 = vadd.f32 %v663_v2, %v528_v8  ;;  %v599_v57 = vpop.permute.xlu0 %598 }
 0x120   : > { %1014 = vtanh.f32 %v565_v5  ;;  %v533_v19 = vpop.f32.mrf.mxu1  ;;  %v563_v20 = vadd.f32 %v549_v56, %v520_v11  ;;  %v522_v21 = vadd.f32 %v521_v14, %v326_v54  ;;  %v671_v22 = vadd.f32 %v659_v58, %v520_v11 }
 0x121   : > { %1016 = vtanh.f32 %v673_v6  ;;  %v567_v24 = vadd.f32 %v559_v61, %v532_v17  ;;  %v534_v25 = vadd.f32 %v533_v19, %v336_v55  ;;  %v675_v26 = vadd.f32 %v667_v23, %v532_v17 }
 0x122   : > { %1018 = vtanh.f32 %v562_v12  ;;  %v564_v28 = vadd.f32 %v549_v56, %v522_v21  ;;  %v672_v29 = vadd.f32 %v659_v58, %v522_v21 }
 0x123   : > { %1020 = vtanh.f32 %v670_v13  ;;  %v568_v30 = vadd.f32 %v559_v61, %v534_v25  ;;  %v676_v31 = vadd.f32 %v667_v23, %v534_v25 }
 0x124   : > { %1022 = vtanh.f32 %v566_v16 }
 0x125   : > { %1024 = vtanh.f32 %v674_v18 }
 0x126   : > { %1026 = vtanh.f32 %v563_v20 }
 0x127   : > { %1028 = vtanh.f32 %v671_v22 }
 0x128   : > { %1030 = vtanh.f32 %v567_v24 }
 0x129   : > { %1032 = vtanh.f32 %v675_v26 }
 0x12a   : > { %1034 = vtanh.f32 %v564_v28 }
 0x12b   : > { %v1011_v32 = vpop.eup %1010  ;;  %1036 = vtanh.f32 %v672_v29 }
 0x12c   : > { %v1013_v34 = vpop.eup %1012  ;;  %1038 = vtanh.f32 %v568_v30  ;;  %v601_v46 = vmul.f32 %v1011_v32, %v584_v15  ;;  %v1106_v30 = vmov 1966171168   ;;  %v636_v32 = vlaneseq }
 0x12d   : > { %v1015_v36 = vpop.eup %1014  ;;  %1040 = vtanh.f32 %v676_v31  ;;  %v709_v49 = vmul.f32 %v1013_v34, %v692_v27  ;;  %v634_v31 = vunpack.c.l.s4 %v1106_v30 }
 0x12e   : > { %v1017_v37 = vpop.eup %1016  ;;  %v605_v53 = vmul.f32 %v1015_v36, %v594_v41  ;;  %vm650_vm1 = vcmp.lt.s32.totalorder %v636_v32, 256 }
 0x12f   : > { %v1019_v38 = vpop.eup %1018  ;;  %v713_v55 = vmul.f32 %v1017_v37, %v702_v43 }
 0x130   : > { %v1021_v39 = vpop.eup %1020  ;;  %v602_v60 = vmul.f32 %v1019_v38, %v584_v15 }
 0x131   : > { %v1023_v40 = vpop.eup %1022  ;;  %v710_v1 = vmul.f32 %v1021_v39, %v692_v27  ;;  %v635_v39 = vunpack.c.0.s8 %v634_v31 }
 0x132   : > { %v1025_v42 = vpop.eup %1024  ;;  %v606_v7 = vmul.f32 %v1023_v40, %v594_v41  ;;  %v637_v40 = vshrl.u32 %v636_v32, 7 }
 0x133   : > { %v1027_v44 = vpop.eup %1026  ;;  %v714_v9 = vmul.f32 %v1025_v42, %v702_v43  ;;  %v627_v43 = vstv %s540_s16 }
 0x134   : > { %v1029_v45 = vpop.eup %1028  ;;  %v603_v47 = vmul.f32 %v1027_v44, %v589_v33 }
 0x135   : > { %v1031_v48 = vpop.eup %1030  ;;  %v711_v50 = vmul.f32 %v1029_v45, %v697_v35 }
 0x136   : > { %v1033_v51 = vpop.eup %1032  ;;  %v609_v52 = vadd.f32 %v603_v47, %v601_v46  ;;  %v607_v63 = vmul.f32 %v1031_v48, %v599_v57  ;;  %v638_v48 = vsub.s32 %v635_v39, %v637_v40 }
 0x137   : > { %v1035_v54 = vpop.eup %1034  ;;  %v717_v56 = vadd.f32 %v711_v50, %v709_v49  ;;  %v715_v2 = vmul.f32 %v1033_v51, %v707_v59 }
 0x138   : > { %v1037_v58 = vpop.eup %1036  ;;  %v604_v61 = vmul.f32 %v1035_v54, %v589_v33  ;;  %v610_v62 = vadd.f32 %v609_v52, %v605_v53 }
 0x139   : > { %v1039_v0 = vpop.eup %1038  ;;  %v718_v3 = vadd.f32 %v717_v56, %v713_v55  ;;  %v712_v4 = vmul.f32 %v1037_v58, %v697_v35 }
 0x13a   : > { %v1041_v5 = vpop.eup %1040  ;;  %v618_v6 = vadd.f32 %v604_v61, %v602_v60  ;;  %v611_v8 = vadd.f32 %v610_v62, %v607_v63  ;;  %v608_v13 = vmul.f32 %v1039_v0, %v599_v57 }
 0x13b   : > { %v719_v10 = vadd.f32 %v718_v3, %v715_v2  ;;  %v726_v11 = vadd.f32 %v712_v4, %v710_v1  ;;  %v716_v15 = vmul.f32 %v1041_v5, %v707_v59 }
 0x13c   : > { %v619_v12 = vadd.f32 %v618_v6, %v606_v7  ;;  %v612_v14 = vrot.slane %v611_v8, 4 }
 0x13d   : > { %v720_v16 = vrot.slane %v719_v10, 4  ;;  %v727_v17 = vadd.f32 %v726_v11, %v714_v9 }
 0x13e   : > { %v613_v18 = vadd.f32 %v612_v14, %v611_v8  ;;  %v620_v19 = vadd.f32 %v619_v12, %v608_v13 }
 0x13f   : > { %v721_v20 = vadd.f32 %v720_v16, %v719_v10  ;;  %v728_v21 = vadd.f32 %v727_v17, %v716_v15 }
 0x140   : > { %v614_v22 = vrot.slane %v613_v18, 2  ;;  %v621_v23 = vrot.slane %v620_v19, 4 }
 0x141   : > { %v722_v24 = vrot.slane %v721_v20, 2  ;;  %v729_v25 = vrot.slane %v728_v21, 4 }
 0x142   : > { %v615_v26 = vadd.f32 %v614_v22, %v613_v18  ;;  %v622_v27 = vadd.f32 %v621_v23, %v620_v19 }
 0x143   : > { %v730_v28 = vadd.f32 %v729_v25, %v728_v21  ;;  %v723_v29 = vadd.f32 %v722_v24, %v721_v20 }
 0x144   : > { %v616_v33 = vrot.slane %v615_v26, 1  ;;  %v623_v34 = vrot.slane %v622_v27, 2 }
 0x145   : > { %v731_v35 = vrot.slane %v730_v28, 2  ;;  %v724_v36 = vrot.slane %v723_v29, 1 }
 0x146   : > { %v624_v37 = vadd.f32 %v623_v34, %v622_v27  ;;  %v617_v41 = vadd.f32 %v616_v33, %v615_v26 }
 0x147   : > { %v732_v38 = vadd.f32 %v731_v35, %v730_v28  ;;  %v725_v44 = vadd.f32 %v724_v36, %v723_v29 }
 0x148   : > { %v625_v42 = vrot.slane %v624_v37, 1  ;;  %v628_v49 = vadd.f32 %v627_v43, %v617_v41 }
 0x149   : > { %v733_v45 = vrot.slane %v732_v38, 1  ;;  %v735_v51 = vadd.f32 %v725_v44, %v627_v43 }
 0x14a   : > { %v626_v46 = vadd.f32 %v625_v42, %v624_v37 }
 0x14b   : > { %v734_v47 = vadd.f32 %v733_v45, %v732_v38 }
 0x14c   : > { %v629_v50 = vadd.f32 %v627_v43, %v626_v46 }
 0x14d   : > { %v736_v52 = vadd.f32 %v734_v47, %v627_v43 }
 0x14e   : > { %v632_v53 = vcombine.low %v628_v49, %v629_v50 }
 0x14f   : > { %v739_v54 = vcombine.low %v735_v51, %v736_v52 }
 0x150   : > { %v639_v55 = vrot.slane %v632_v53, %v638_v48 }
 0x151   : > { %v746_v56 = vrot.slane %v739_v54, %v638_v48  ;;  %764 = sbr.rel (!%p1184_p5) target bundleno = 368 (0x170), region = 48 }
 0x152   : > { %v646_v57 = vrot.slane %v639_v55, %v638_v48 }
 0x153   : > { %v753_v58 = vrot.slane %v746_v56, %v638_v48 }
 0x154   : > { %652 = vst.msk [vmem:[%s258_s18] ss:$2 sm:$0x3] %vm650_vm1, %v646_v57 }
 0x155   : > { %880 = vst.msk [vmem:[%s258_s18 + $0x1] ss:$2 sm:$0x3] %vm650_vm1, %v753_v58 }
 0x156   : > { %s1432_s21 = smov (!%p767_p11, %s766_s21), 2 }
 0x157   : > { %s1374_s22 = sshll.u32 %s1432_s21, 5 }
 0x158   : > { %s771_s27 = ssub.s32 64, %s1374_s22 }
 0x159   : > { %772 = vsyncadd %s1369_s19, %s771_s27  ;;  %p884_p12 = scmp.ne.s32.totalorder %s1374_s22, 0  ;;  %s890_s30 = sshll.u32 %s1167_s5, 6 }
 0x15a   : > { %s775_s11 = scalar_lea.hbm %s1422_s6, %s890_s30  ;;  %s778_s12 = sshll.u32 %s258_s18, 4  ;;  %s779_s12 = int_to_ptr.vmem [resolvable:$true] %s778_s12 }
 0x15b   : > { %s1042_s13 = scalar_lea.vmem %s779_s12, %s1374_s22  ;;  %s1107_s14 = smov [#allocation3]  }
 0x15c   : > { %p1043_p13 = scmp.ne.s32.totalorder %s779_s12, %s1042_s13  ;;  %s1046_s15 = sshll.u32 %s1107_s14, 4  ;;  %s1047_s15 = int_to_ptr.vmem [resolvable:$false] %s1046_s15 }
 0x15d   : > { %s1048_s29 = scalar_lea.vmem %s1047_s15, 128  ;;  %p1049_p2 = scmp.lt.s32.totalorder %s779_s12, %s1047_s15 }
 0x15e   : > { %p1044_p0 = pnand %p1043_p13, %p884_p12  ;;  %p1050_p3 = scmp.lt.s32.totalorder %s1048_s29, %s1042_s13 }
 0x160   : > { %p1045_p1 = pneg %p1044_p0  ;;  %p1051_p4 = por %p1050_p3, %p1049_p2 }
 0x162   : > { %p1052_p5 = pnand %p1051_p4, %p1045_p1 }
 0x164   : > { %1055 = shalt.err (!%p1052_p5)
}
 0x165   : > { %s1056_s5 = scalar_lea.hbm %s775_s11, %s1374_s22  ;;  %s1060_s18 = scalar_lea.hbm %s1422_s6, 96 }
 0x166   : > { %p1057_p7 = scmp.ne.s32.totalorder %s775_s11, %s1056_s5  ;;  %p1061_p10 = scmp.lt.s32.totalorder %s775_s11, %s1422_s6 }
 0x167   : > { %p1062_p11 = scmp.lt.s32.totalorder %s1060_s18, %s1056_s5 }
 0x168   : > { %p1058_p8 = pnand %p1057_p7, %p884_p12 }
 0x169   : > { %p1063_p13 = por %p1062_p11, %p1061_p10 }
 0x16a   : > { %p1059_p9 = pneg %p1058_p8 }
 0x16c   : > { %p1064_p0 = pnand %p1063_p13, %p1059_p9 }
 0x16e   : > { %1067 = shalt.err (!%p1064_p0)
}
 0x16f   : > { %781 = dma.vmem_to_hbm [thread:$0]  (%p884_p12), %s779_s12, %s1374_s22, %s775_s11, %s1369_s19  }
 0x170 PF: > { %p968_p1 = scmp.ge.s32.totalorder %s1102_s26, 2  ;;  %s790_s27 = sand.u32 1, %s1090_s23  }
 0x171   : > { %s791_s30 = scalar_lea.sflag [#allocation4], %s790_s27 }
 0x172   : > { %p965_p2 = pnand %p968_p1, %p1188_p6 }
 0x174   : > { %p966_p3 = pneg %p965_p2 }
 0x176   : > { %1085 = dma.done.wait (%p966_p3), %s791_s30, 64  }
 0x177   : > { %1087 = vsyncadd (%p966_p3), %s791_s30, 4294967232  ;;  %p17_p4 = scmp.ge.s32.totalorder %s1171_s28, 4   ;;  %s1425_s23 = smov %s1094_s24 }
 0x178   : > { %s1426_s24 = smov %s1098_s25  ;;  %s1427_s25 = smov %s1182_s7 }
 0x179   : > { %s1428_s26 = smov %s1171_s28  ;;  %19 = sbr.rel (!%p17_p4) target bundleno = 5 (0x5), region = 80 }
 0x17e   :  { %796 = vsyncpa [#allocation4], 1 }
 0x17f   :  { %798 = vsyncpa [#allocation4 + $0x1], 1 }

</bundles_post_ra>
